<compile_context>
chip_gen: v7x
topology: tpu7x:2x2x1
jax: 0.10.0
libtpu: 0.0.40
codegen_flags: <defaults>
</compile_context>

<pallas_src>
import math
import functools

import jax
import jax.numpy as jnp
from jax.experimental import pallas as pl
from jax.experimental.pallas import tpu as pltpu


def _round_up(x, m):
    return ((x + m - 1) // m) * m


def dn2_kernel(x_ref, w1_ref, w2_ref, w3_ref, w4_ref, b_ref, o_ref):
    """Fused forward for one batch tile: 3x (Linear+ReLU) + Linear.

    x_ref : (TB, state_len) f32      -- cast to the weight dtype in-kernel
    w*_ref: (in_p, out_p)   bf16/f32 -- VMEM-resident across the whole grid
    b_ref : (1, h1+h2+h3+dout) f32   -- all biases packed, static 128-aligned slices
    o_ref : (TB, dout_p)    f32
    """
    h1 = w1_ref.shape[1]
    h2 = w2_ref.shape[1]
    h3 = w3_ref.shape[1]
    dout = w4_ref.shape[1]

    x = x_ref[...].astype(w1_ref.dtype)

    h = jnp.dot(x, w1_ref[...], preferred_element_type=jnp.float32)
    h = jnp.maximum(h + b_ref[:, 0:h1], 0.0)

    h = jnp.dot(h.astype(w2_ref.dtype), w2_ref[...],
                preferred_element_type=jnp.float32)
    h = jnp.maximum(h + b_ref[:, h1:h1 + h2], 0.0)

    h = jnp.dot(h.astype(w3_ref.dtype), w3_ref[...],
                preferred_element_type=jnp.float32)
    h = jnp.maximum(h + b_ref[:, h1 + h2:h1 + h2 + h3], 0.0)

    q = jnp.dot(h.astype(w4_ref.dtype), w4_ref[...],
                preferred_element_type=jnp.float32)
    q = q + b_ref[:, h1 + h2 + h3:h1 + h2 + h3 + dout]
    o_ref[...] = q.astype(o_ref.dtype)


def init_dn2_params(key, state_len, numb_actions, weight_dtype=jnp.bfloat16):
    """PyTorch-style uniform(+-1/sqrt(fan_in)) init, weights stored (in, out).

    Layer-1 fan_in stays UNPADDED (K=state_len); all fan_out dims (and the
    matching downstream fan_in dims) are zero-padded to multiples of 128.
    Padded bias entries are zero, so ReLU(0)=0 feeds zero weight rows and the
    padding is numerically exact.  Biases are packed into one (1, sum) f32 row.
    """
    dims = [state_len, state_len * 5, state_len * 10, state_len * 5, numb_actions]
    pdims = [dims[0]] + [_round_up(d, 128) for d in dims[1:]]
    keys = jax.random.split(key, 2 * (len(dims) - 1))
    weights = []
    biases = []
    for i in range(len(dims) - 1):
        fan_in, fan_out = dims[i], dims[i + 1]
        bound = 1.0 / math.sqrt(fan_in)
        w = jax.random.uniform(keys[2 * i], (fan_in, fan_out),
                               minval=-bound, maxval=bound, dtype=jnp.float32)
        b = jax.random.uniform(keys[2 * i + 1], (fan_out,),
                               minval=-bound, maxval=bound, dtype=jnp.float32)
        w_pad = jnp.pad(w, ((0, pdims[i] - fan_in), (0, pdims[i + 1] - fan_out)))
        b_pad = jnp.pad(b, (0, pdims[i + 1] - fan_out))
        weights.append(w_pad.astype(weight_dtype))
        biases.append(b_pad)
    bias_packed = jnp.concatenate(biases).reshape(1, -1).astype(jnp.float32)
    return tuple(weights), bias_packed


@functools.partial(jax.jit, static_argnames=("state_len", "numb_actions", "block_b"))
def dn2_forward(t, params, state_len, numb_actions, block_b=1024):
    """Matches DN2.forward: t.reshape(-1, state_len) -> Q-values (B, numb_actions)."""
    weights, bias = params
    w1, w2, w3, w4 = weights
    dout_p = w4.shape[1]

    x = jnp.asarray(t, jnp.float32).reshape(-1, state_len)
    B = x.shape[0]

    # Minimal batch pad to a multiple of 16 (bf16 sublane packing); no feature
    # padding and no dtype cast here -- both happen in-kernel.
    Bp = _round_up(B, 16)
    if Bp != B:
        x = jnp.pad(x, ((0, Bp - B), (0, 0)))

    # Batch tile: multiple of 16, capped at block_b; when the batch is big
    # enough, cap so the grid has >=2 steps (both v7x TensorCores get work).
    TB = min(_round_up(block_b, 16), Bp)
    if Bp > 16:
        TB = min(TB, _round_up(pl.cdiv(Bp, 2), 16))
    grid = (pl.cdiv(Bp, TB),)

    def resident(shape):
        # Same block index every grid step -> DMA'd once, stays VMEM-resident.
        return pl.BlockSpec(shape, lambda i: (0, 0))

    in_specs = [
        pl.BlockSpec((TB, state_len), lambda i: (i, 0)),
        resident(w1.shape), resident(w2.shape),
        resident(w3.shape), resident(w4.shape),
        resident(bias.shape),
    ]
    out_specs = pl.BlockSpec((TB, dout_p), lambda i: (i, 0))

    flops = 2 * Bp * (w1.shape[0] * w1.shape[1] + w2.shape[0] * w2.shape[1]
                      + w3.shape[0] * w3.shape[1] + w4.shape[0] * w4.shape[1])
    param_bytes = sum(int(a.size) * a.dtype.itemsize for a in (w1, w2, w3, w4, bias))
    bytes_accessed = param_bytes + int(x.size) * 4 + Bp * dout_p * 4
    cost = pl.CostEstimate(flops=flops, transcendentals=0,
                           bytes_accessed=bytes_accessed)

    out_padded = pl.pallas_call(
        dn2_kernel,
        out_shape=jax.ShapeDtypeStruct((Bp, dout_p), jnp.float32),
        grid=grid,
        in_specs=in_specs,
        out_specs=out_specs,
        compiler_params=pltpu.CompilerParams(
            dimension_semantics=("parallel",)),
        cost_estimate=cost,
    )(x, w1, w2, w3, w4, bias)

    return out_padded[:B, :numb_actions]


def dn2_reference(t, params, state_len, numb_actions):
    """Pure-JAX f32 reference using the (padded) params."""
    weights, bias = params
    x = jnp.asarray(t, jnp.float32).reshape(-1, state_len)
    off = 0
    for i, w in enumerate(weights):
        wf = w.astype(jnp.float32)
        n = wf.shape[1]
        x = x @ wf + bias[:, off:off + n]
        off += n
        if i < len(weights) - 1:
            x = jnp.maximum(x, 0.0)
    return x[:, :numb_actions]


if __name__ == "__main__":
    state_len = 32
    numb_actions = 4

    key = jax.random.PRNGKey(0)
    k_params, k1, k2, k3 = jax.random.split(key, 4)

    # f32 params (tight checks) and bf16 params (fast path, loose check),
    # generated from the same keys so they share underlying values.
    params_f32 = init_dn2_params(k_params, state_len, numb_actions, jnp.float32)
    params_bf16 = init_dn2_params(k_params, state_len, numb_actions, jnp.bfloat16)

    # --- check 1: small batch, single grid step, f32 weights ---
    t1 = jax.random.normal(k1, (8, state_len), dtype=jnp.float32)
    q1 = jax.block_until_ready(dn2_forward(t1, params_f32, state_len, numb_actions))
    q1_ref = dn2_reference(t1, params_f32, state_len, numb_actions)
    assert q1.shape == (8, numb_actions)
    assert jnp.allclose(q1, q1_ref, atol=1e-4, rtol=1e-4)

    # --- check 2: multi-step grid, bf16 weight fast path ---
    t2 = jax.random.normal(k2, (20, state_len), dtype=jnp.float32)
    q2 = jax.block_until_ready(
        dn2_forward(t2, params_bf16, state_len, numb_actions, block_b=8))
    q2_ref = dn2_reference(t2, params_f32, state_len, numb_actions)
    assert q2.shape == (20, numb_actions)
    assert jnp.allclose(q2, q2_ref, atol=3e-2, rtol=3e-2)

    # --- check 3: partial (masked) last batch block, f32 weights ---
    t3 = jax.random.normal(k3, (40, state_len), dtype=jnp.float32)
    q3 = jax.block_until_ready(
        dn2_forward(t3, params_f32, state_len, numb_actions, block_b=32))
    q3_ref = dn2_reference(t3, params_f32, state_len, numb_actions)
    assert q3.shape == (40, numb_actions)
    assert jnp.allclose(q3, q3_ref, atol=1e-4, rtol=1e-4)

    print("KERNEL_OK")
</pallas_src>

<mosaic_0001>
module attributes {stable_mosaic.version = 11 : i64} {
  func.func @dn2_kernel(%arg0: i32, %arg1: memref<16x32xf32, #tpu.memory_space<vmem>>, %arg2: memref<32x256xf32, #tpu.memory_space<vmem>>, %arg3: memref<256x384xf32, #tpu.memory_space<vmem>>, %arg4: memref<384x256xf32, #tpu.memory_space<vmem>>, %arg5: memref<256x128xf32, #tpu.memory_space<vmem>>, %arg6: memref<1x1024xf32, #tpu.memory_space<vmem>>, %arg7: memref<16x128xf32, #tpu.memory_space<vmem>>) attributes {dimension_semantics = [#tpu.dimension_semantics<parallel>], iteration_bounds = array<i64: 1>, scalar_prefetch = 0 : i64, scratch_operands = 0 : i64, tpu.core_type = #tpu.core_type<tc>, window_params = [{transform_indices = @transform_0, window_bounds = array<i64: 16, 32>}, {pipeline_mode = #tpu.pipeline_mode<synchronous>, transform_indices = @transform_1, window_bounds = array<i64: 32, 256>}, {pipeline_mode = #tpu.pipeline_mode<synchronous>, transform_indices = @transform_2, window_bounds = array<i64: 256, 384>}, {pipeline_mode = #tpu.pipeline_mode<synchronous>, transform_indices = @transform_3, window_bounds = array<i64: 384, 256>}, {pipeline_mode = #tpu.pipeline_mode<synchronous>, transform_indices = @transform_4, window_bounds = array<i64: 256, 128>}, {pipeline_mode = #tpu.pipeline_mode<synchronous>, transform_indices = @transform_5, window_bounds = array<i64: 1, 1024>}, {transform_indices = @transform_6, window_bounds = array<i64: 16, 128>}]} {
    %c0 = arith.constant 0 : index
    %c0_0 = arith.constant 0 : index
    %0 = vector.load %arg1[%c0, %c0_0] : memref<16x32xf32, #tpu.memory_space<vmem>>, vector<16x32xf32>
    %c0_1 = arith.constant 0 : index
    %c0_2 = arith.constant 0 : index
    %1 = vector.load %arg2[%c0_1, %c0_2] : memref<32x256xf32, #tpu.memory_space<vmem>>, vector<32x256xf32>
    %cst = arith.constant dense<0.000000e+00> : vector<16x256xf32>
    %2 = tpu.matmul %0, %1, %cst {dimension_numbers = #tpu.dot_dimension_numbers<[1], [0], [0], [1], [0, 0, 1, 1], [], []>} : vector<16x32xf32>, vector<32x256xf32>, vector<16x256xf32> -> vector<16x256xf32>
    %c0_3 = arith.constant 0 : index
    %c0_4 = arith.constant 0 : index
    %3 = vector.load %arg6[%c0_3, %c0_4] : memref<1x1024xf32, #tpu.memory_space<vmem>>, vector<1x256xf32>
    %4 = vector.broadcast %3 : vector<1x256xf32> to vector<16x256xf32>
    %5 = arith.addf %2, %4 : vector<16x256xf32>
    %cst_5 = arith.constant 0.000000e+00 : f32
    %6 = vector.broadcast %cst_5 : f32 to vector<16x256xf32>
    %7 = arith.maximumf %5, %6 : vector<16x256xf32>
    %c0_6 = arith.constant 0 : index
    %c0_7 = arith.constant 0 : index
    %8 = vector.load %arg3[%c0_6, %c0_7] : memref<256x384xf32, #tpu.memory_space<vmem>>, vector<256x384xf32>
    %cst_8 = arith.constant dense<0.000000e+00> : vector<16x384xf32>
    %9 = tpu.matmul %7, %8, %cst_8 {dimension_numbers = #tpu.dot_dimension_numbers<[1], [0], [0], [1], [0, 0, 1, 1], [], []>} : vector<16x256xf32>, vector<256x384xf32>, vector<16x384xf32> -> vector<16x384xf32>
    %c0_9 = arith.constant 0 : index
    %c256 = arith.constant 256 : index
    %10 = vector.load %arg6[%c0_9, %c256] : memref<1x1024xf32, #tpu.memory_space<vmem>>, vector<1x384xf32>
    %11 = vector.broadcast %10 : vector<1x384xf32> to vector<16x384xf32>
    %12 = arith.addf %9, %11 : vector<16x384xf32>
    %cst_10 = arith.constant 0.000000e+00 : f32
    %13 = vector.broadcast %cst_10 : f32 to vector<16x384xf32>
    %14 = arith.maximumf %12, %13 : vector<16x384xf32>
    %c0_11 = arith.constant 0 : index
    %c0_12 = arith.constant 0 : index
    %15 = vector.load %arg4[%c0_11, %c0_12] : memref<384x256xf32, #tpu.memory_space<vmem>>, vector<384x256xf32>
    %cst_13 = arith.constant dense<0.000000e+00> : vector<16x256xf32>
    %16 = tpu.matmul %14, %15, %cst_13 {dimension_numbers = #tpu.dot_dimension_numbers<[1], [0], [0], [1], [0, 0, 1, 1], [], []>} : vector<16x384xf32>, vector<384x256xf32>, vector<16x256xf32> -> vector<16x256xf32>
    %c0_14 = arith.constant 0 : index
    %c640 = arith.constant 640 : index
    %17 = vector.load %arg6[%c0_14, %c640] : memref<1x1024xf32, #tpu.memory_space<vmem>>, vector<1x256xf32>
    %18 = vector.broadcast %17 : vector<1x256xf32> to vector<16x256xf32>
    %19 = arith.addf %16, %18 : vector<16x256xf32>
    %cst_15 = arith.constant 0.000000e+00 : f32
    %20 = vector.broadcast %cst_15 : f32 to vector<16x256xf32>
    %21 = arith.maximumf %19, %20 : vector<16x256xf32>
    %c0_16 = arith.constant 0 : index
    %c0_17 = arith.constant 0 : index
    %22 = vector.load %arg5[%c0_16, %c0_17] : memref<256x128xf32, #tpu.memory_space<vmem>>, vector<256x128xf32>
    %cst_18 = arith.constant dense<0.000000e+00> : vector<16x128xf32>
    %23 = tpu.matmul %21, %22, %cst_18 {dimension_numbers = #tpu.dot_dimension_numbers<[1], [0], [0], [1], [0, 0, 1, 1], [], []>} : vector<16x256xf32>, vector<256x128xf32>, vector<16x128xf32> -> vector<16x128xf32>
    %c0_19 = arith.constant 0 : index
    %c896 = arith.constant 896 : index
    %24 = vector.load %arg6[%c0_19, %c896] : memref<1x1024xf32, #tpu.memory_space<vmem>>, vector<1x128xf32>
    %25 = vector.broadcast %24 : vector<1x128xf32> to vector<16x128xf32>
    %26 = arith.addf %23, %25 : vector<16x128xf32>
    %c0_20 = arith.constant 0 : index
    %c0_21 = arith.constant 0 : index
    %27 = vector.load %arg7[%c0_20, %c0_21] : memref<16x128xf32, #tpu.memory_space<vmem>>, vector<16x128xf32>
    tpu.vector_store %arg7[%c0_20, %c0_21], %26 {strides = array<i32>} : memref<16x128xf32, #tpu.memory_space<vmem>>, vector<16x128xf32>,
    return
  }
  func.func @transform_0(%arg0: i32) -> (i32, i32) {
    %c0_i32 = arith.constant 0 : i32
    %c0_i32_0 = arith.constant 0 : i32
    return %arg0, %c0_i32 : i32, i32
  }
  func.func @transform_1(%arg0: i32) -> (i32, i32) {
    %c0_i32 = arith.constant 0 : i32
    %c0_i32_0 = arith.constant 0 : i32
    %c0_i32_1 = arith.constant 0 : i32
    return %c0_i32, %c0_i32_0 : i32, i32
  }
  func.func @transform_2(%arg0: i32) -> (i32, i32) {
    %c0_i32 = arith.constant 0 : i32
    %c0_i32_0 = arith.constant 0 : i32
    %c0_i32_1 = arith.constant 0 : i32
    return %c0_i32, %c0_i32_0 : i32, i32
  }
  func.func @transform_3(%arg0: i32) -> (i32, i32) {
    %c0_i32 = arith.constant 0 : i32
    %c0_i32_0 = arith.constant 0 : i32
    %c0_i32_1 = arith.constant 0 : i32
    return %c0_i32, %c0_i32_0 : i32, i32
  }
  func.func @transform_4(%arg0: i32) -> (i32, i32) {
    %c0_i32 = arith.constant 0 : i32
    %c0_i32_0 = arith.constant 0 : i32
    %c0_i32_1 = arith.constant 0 : i32
    return %c0_i32, %c0_i32_0 : i32, i32
  }
  func.func @transform_5(%arg0: i32) -> (i32, i32) {
    %c0_i32 = arith.constant 0 : i32
    %c0_i32_0 = arith.constant 0 : i32
    %c0_i32_1 = arith.constant 0 : i32
    return %c0_i32, %c0_i32_0 : i32, i32
  }
  func.func @transform_6(%arg0: i32) -> (i32, i32) {
    %c0_i32 = arith.constant 0 : i32
    %c0_i32_0 = arith.constant 0 : i32
    return %arg0, %c0_i32 : i32, i32
  }
}

</mosaic_0001>

<bundles_post_ra>
// kernel: dn2_forward.1
= control target key start
LH: loop header
LB: loop body
LE: loop exit
PB: predicated region body
PF: predicated region fallthrough
CT: control target
= control target key end

     0   :  { %11 = vsyncpa [#allocation3], 0  ;;  %s1426_s0 = inlined_call_operand.vmem [shape: f32[16,32], index: 0, kind: input, shape index: {}]   ;;  %s1427_s1 = inlined_call_operand.hbm [shape: f32[32,256], index: 1, kind: input, shape index: {}]   ;;  %s1428_s2 = inlined_call_operand.hbm [shape: f32[256,384], index: 2, kind: input, shape index: {}]   ;;  %s1429_s3 = inlined_call_operand.hbm [shape: f32[384,256], index: 3, kind: input, shape index: {}]   ;;  %s1430_s4 = inlined_call_operand.hbm [shape: f32[256,128], index: 4, kind: input, shape index: {}]   ;;  %s1431_s5 = inlined_call_operand.vmem [shape: f32[1,1024], index: 5, kind: input, shape index: {}]   ;;  %s1432_s6 = inlined_call_operand.vmem [shape: f32[16,128], index: 6, kind: output, shape index: {}]  }
   0x1   :  { %12 = vsyncpa [#allocation5], 0 }
   0x2   :  { %13 = vsyncpa [#allocation8], 0  ;;  %s1272_s21 = smov [#allocation4]   ;;  %s1178_s25 = scalar_lea.hbm %s1428_s2, 12288 }
   0x3   :  { %s33_s22 = sshll.u32 %s1272_s21, 4  ;;  %p1179_p0 = scmp.ne.s32.totalorder %s1428_s2, %s1178_s25  ;;  %s34_s22 = int_to_ptr.vmem [resolvable:$true] %s33_s22 }
   0x4   :  { %p1182_p1 = scmp.lt.u32.totalorder %s1178_s25, %s1428_s2 }
   0x6   :  { %p1184_p2 = pnand %p1182_p1, %p1179_p0 }
   0x8   :  { %1187 = shalt.err (!%p1184_p2)
}
   0x9   :  { %s1188_s30 = scalar_lea.vmem %s34_s22, 12288  ;;  %p1193_p4 = scmp.lt.s32.totalorder %s34_s22, %s34_s22 }
   0xa   :  { %p1189_p3 = scmp.ne.s32.totalorder %s34_s22, %s1188_s30  ;;  %p1194_p5 = scmp.lt.s32.totalorder %s1188_s30, %s1188_s30 }
   0xc   :  { %p1195_p6 = por %p1194_p5, %p1193_p4 }
   0xe   :  { %p1196_p7 = pnand %p1195_p6, %p1189_p3 }
  0x10   :  { %1199 = shalt.err (!%p1196_p7)
}
  0x11   :  { %s1273_s7 = smov 384   ;;  %s1274_s8 = smov 24  }
  0x12   :  { %39 = dma.hbm_to_vmem [thread:$0]  %s1428_s2, 12288, %s34_s22, [#allocation5], %s1273_s7, %s1273_s7, %s1274_s8  }
  0x13   :  { %s1275_s11 = smov [#allocation2]   ;;  %s1200_s15 = scalar_lea.hbm %s1427_s1, 1024 }
  0x14   :  { %s21_s12 = sshll.u32 %s1275_s11, 4  ;;  %p1201_p8 = scmp.ne.s32.totalorder %s1427_s1, %s1200_s15  ;;  %s22_s12 = int_to_ptr.vmem [resolvable:$true] %s21_s12 }
  0x15   :  { %p1204_p9 = scmp.lt.u32.totalorder %s1200_s15, %s1427_s1 }
  0x17   :  { %p1206_p10 = pnand %p1204_p9, %p1201_p8 }
  0x19   :  { %1209 = shalt.err (!%p1206_p10)
}
  0x1a   :  { %s1210_s20 = scalar_lea.vmem %s22_s12, 1024  ;;  %p1215_p12 = scmp.lt.s32.totalorder %s22_s12, %s22_s12 }
  0x1b   :  { %p1211_p11 = scmp.ne.s32.totalorder %s22_s12, %s1210_s20  ;;  %p1216_p13 = scmp.lt.s32.totalorder %s1210_s20, %s1210_s20 }
  0x1d   :  { %p1217_p0 = por %p1216_p13, %p1215_p12 }
  0x1f   :  { %p1218_p1 = pnand %p1217_p0, %p1211_p11 }
  0x21   :  { %1221 = shalt.err (!%p1218_p1)
}
  0x22   :  { %s1276_s2 = smov 256   ;;  %s1277_s21 = smov 16  }
  0x23   :  { %27 = dma.hbm_to_vmem [thread:$0]  %s1427_s1, 1024, %s22_s12, [#allocation3], %s1276_s2, %s1276_s2, %s1277_s21  }
  0x24   :  { %s1278_s24 = smov [#allocation6]   ;;  %s1279_s26 = smov [#allocation7]  }
  0x25   :  { %s45_s25 = sshll.u32 %s1278_s24, 4  ;;  %s57_s27 = sshll.u32 %s1279_s26, 4  ;;  %s46_s25 = int_to_ptr.vmem [resolvable:$true] %s45_s25  ;;  %s1342_s27 = int_to_ptr.vmem [resolvable:$true] %s57_s27 }
  0x26   :  { %s1222_s30 = scalar_lea.hbm %s1429_s3, 12288 }
  0x27   :  { %p1223_p2 = scmp.ne.s32.totalorder %s1429_s3, %s1222_s30  ;;  %p1226_p3 = scmp.lt.u32.totalorder %s1222_s30, %s1429_s3 }
  0x29   :  { %p1228_p4 = pnand %p1226_p3, %p1223_p2 }
  0x2b   :  { %1231 = shalt.err (!%p1228_p4)
}
  0x2c   :  { %s1232_s1 = scalar_lea.vmem %s46_s25, 12288  ;;  %p1237_p6 = scmp.lt.s32.totalorder %s46_s25, %s46_s25 }
  0x2d   :  { %p1233_p5 = scmp.ne.s32.totalorder %s46_s25, %s1232_s1  ;;  %p1238_p7 = scmp.lt.s32.totalorder %s1232_s1, %s1232_s1 }
  0x2f   :  { %p1239_p8 = por %p1238_p7, %p1237_p6 }
  0x31   :  { %p1240_p9 = pnand %p1239_p8, %p1233_p5 }
  0x33   :  { %1243 = shalt.err (!%p1240_p9)
}
  0x34   :  { %51 = dma.hbm_to_vmem [thread:$0]  %s1429_s3, 12288, %s46_s25, [#allocation5], %s1276_s2, %s1276_s2, %s1277_s21  }
  0x35   :  { %s1244_s15 = scalar_lea.hbm %s1430_s4, 4096 }
  0x36   :  { %p1245_p10 = scmp.ne.s32.totalorder %s1430_s4, %s1244_s15  ;;  %p1248_p11 = scmp.lt.u32.totalorder %s1244_s15, %s1430_s4 }
  0x38   :  { %p1250_p12 = pnand %p1248_p11, %p1245_p10 }
  0x3a   :  { %1253 = shalt.err (!%p1250_p12)
}
  0x3b   :  { %s1254_s20 = scalar_lea.vmem %s1342_s27, 4096  ;;  %p1259_p0 = scmp.lt.s32.totalorder %s1342_s27, %s1342_s27 }
  0x3c   :  { %p1255_p13 = scmp.ne.s32.totalorder %s1342_s27, %s1254_s20  ;;  %p1260_p1 = scmp.lt.s32.totalorder %s1254_s20, %s1254_s20 }
  0x3e   :  { %p1261_p2 = por %p1260_p1, %p1259_p0 }
  0x40   :  { %p1262_p3 = pnand %p1261_p2, %p1255_p13 }
  0x42   :  { %1265 = shalt.err (!%p1262_p3)
}
  0x43   :  { %s1280_s3 = smov 128   ;;  %s1281_s2 = smov 8  }
  0x44   :  { %63 = dma.hbm_to_vmem [thread:$0]  %s1430_s4, 4096, %s1342_s27, [#allocation8], %s1280_s3, %s1280_s3, %s1281_s2  }
  0x45   :  { %1266 = dma.done.wait [#allocation3], 1024  }
  0x46   :  { %1267 = vsyncadd [#allocation3], 4294966272 }
  0x47   :  { %1268 = dma.done.wait [#allocation5], 24576  }
  0x48   :  { %1269 = vsyncadd [#allocation5], 4294942720 }
  0x49   :  { %1270 = dma.done.wait [#allocation8], 4096  }
  0x4a   :  { %1271 = vsyncadd [#allocation8], 4294963200  ;;  %v1282_v0 = vmov 0.0   ;;  %v81_v1 = vld [vmem:[#allocation2 + $0x8] sm:$0xff]  ;;  %v83_v2 = vld [vmem:[#allocation2 + $0x18] sm:$0xff]  ;;  %vm100_vm0 = vcmask 261120  }
  0x4b   :  { %171 = vmatprep.mubr.f32.mxu1 %v1282_v0  ;;  %v80_v3 = vld [vmem:[#allocation2] sm:$0xff]  ;;  %v927_v4 = vpack.c.bf16 %v83_v2, %v81_v1  ;;  %v82_v5 = vld [vmem:[#allocation2 + $0x10] sm:$0xff]  ;;  %v85_v6 = vld [vmem:[#allocation2 + $0x28] sm:$0xff] }
  0x4c   :  { %v87_v7 = vld [vmem:[#allocation2 + $0x38] sm:$0xff]  ;;  %v929_v8 = vpack.c.bf16 %v82_v5, %v80_v3  ;;  %v84_v10 = vld [vmem:[#allocation2 + $0x20] sm:$0xff]  ;;  %v86_v11 = vld [vmem:[#allocation2 + $0x30] sm:$0xff] }
  0x4d   :  { %v931_v9 = vpack.c.bf16 %v87_v7, %v85_v6  ;;  %928 = vmatprep.subr.bf16.mxu1 %v927_v4  ;;  %v189_v12 = vld [vmem:[#allocation4 + $0x8] sm:$0xff]  ;;  %v192_v13 = vld [vmem:[#allocation4 + $0x20] sm:$0xff]  ;;  %v933_v14 = vpack.c.bf16 %v86_v11, %v84_v10  ;;  %v191_v17 = vld [vmem:[#allocation4 + $0x18] sm:$0xff] }
  0x4e   :  { %930 = vmatpush1.bf16.msra.mxu1 %v929_v8  ;;  %v935_v15 = vpack.c.bf16 %v192_v13, %v189_v12  ;;  %v188_v16 = vld [vmem:[#allocation4] sm:$0xff]  ;;  %v195_v18 = vld [vmem:[#allocation4 + $0x38] sm:$0xff]  ;;  %v198_v19 = vld [vmem:[#allocation4 + $0x50] sm:$0xff] }
  0x4f   :  { %932 = vmatprep.subr.bf16.mxu1 %v931_v9  ;;  %v78_v20 = vld [vmem:[%s1426_s0] sm:$0xff]  ;;  %v937_v21 = vpack.c.bf16 %v191_v17, %v188_v16  ;;  %v939_v22 = vpack.c.bf16 %v198_v19, %v195_v18  ;;  %v194_v23 = vld [vmem:[#allocation4 + $0x30] sm:$0xff]  ;;  %v197_v24 = vld [vmem:[#allocation4 + $0x48] sm:$0xff] }
  0x50   :  { %v201_v25 = vld [vmem:[#allocation4 + $0x68] sm:$0xff]  ;;  %v204_v26 = vld [vmem:[#allocation4 + $0x80] sm:$0xff]  ;;  %v941_v28 = vpack.c.bf16 %v197_v24, %v194_v23  ;;  %v203_v31 = vld [vmem:[#allocation4 + $0x78] sm:$0xff] }
  0x51   :  { %v79_v27 = vld [vmem:[%s1426_s0 + $0x8] sm:$0xff]  ;;  %v943_v29 = vpack.c.bf16 %v204_v26, %v201_v25  ;;  %v200_v30 = vld [vmem:[#allocation4 + $0x60] sm:$0xff]  ;;  %v207_v32 = vld [vmem:[#allocation4 + $0x98] sm:$0xff] }
  0x52   :  { %934 = vmatpush1.bf16.msra.mxu1 %v933_v14  ;;  %v210_v33 = vld [vmem:[#allocation4 + $0xb0] sm:$0xff]  ;;  %v241_v35 = vld [vmem:[#allocation4 + $0x1a8] sm:$0xff]  ;;  %v945_v36 = vpack.c.bf16 %v203_v31, %v200_v30  ;;  %v244_v44 = vld [vmem:[#allocation4 + $0x1c0] sm:$0xff] }
  0x53   :  { %936 = vmatprep.subr.bf16.mxu1 %v935_v15  ;;  %v238_v34 = vld [vmem:[#allocation4 + $0x190] sm:$0xff]  ;;  %v193_v40 = vld [vmem:[#allocation4 + $0x28] sm:$0xff]  ;;  %v947_v41 = vpack.c.bf16 %v210_v33, %v207_v32  ;;  %v247_v45 = vld [vmem:[#allocation4 + $0x1d8] sm:$0xff] }
  0x54   :  { %v206_v37 = vld [vmem:[#allocation4 + $0x90] sm:$0xff]  ;;  %v999_v38 = vpack.c.bf16 %v241_v35, %v238_v34  ;;  %v209_v42 = vld [vmem:[#allocation4 + $0xa8] sm:$0xff]  ;;  %v216_v47 = vld [vmem:[#allocation4 + $0xe0] sm:$0xff]  ;;  %v1003_v48 = vpack.c.bf16 %v247_v45, %v244_v44 }
  0x55   :  { %848 = vmatmul.mubr.msk.f32.vlgmr.msra.gmra.mrb[0].mxu1 %vm100_vm0, %v78_v20  ;;  %v190_v39 = vld [vmem:[#allocation4 + $0x10] sm:$0xff]  ;;  %v213_v46 = vld [vmem:[#allocation4 + $0xc8] sm:$0xff]  ;;  %v196_v49 = vld [vmem:[#allocation4 + $0x40] sm:$0xff]  ;;  %v949_v51 = vpack.c.bf16 %v209_v42, %v206_v37 }
  0x56   :  { %177 = vmatprep.mubr.f32.mxu1 %v1282_v0  ;;  %938 = vmatpush1.bf16.msra.mxu1 %v937_v21  ;;  %v1001_v43 = vpack.c.bf16 %v193_v40, %v190_v39  ;;  %v199_v50 = vld [vmem:[#allocation4 + $0x58] sm:$0xff]  ;;  %v212_v52 = vld [vmem:[#allocation4 + $0xc0] sm:$0xff]  ;;  %v250_v54 = vld [vmem:[#allocation4 + $0x1f0] sm:$0xff]  ;;  %v951_v56 = vpack.c.bf16 %v216_v47, %v213_v46 }
  0x57   :  { %940 = vmatprep.subr.bf16.mxu1 %v939_v22  ;;  %1000 = vmatprep.subr.bf16.mxu0 %v999_v38  ;;  %v1005_v53 = vpack.c.bf16 %v199_v50, %v196_v49  ;;  %v253_v55 = vld [vmem:[#allocation4 + $0x208] sm:$0xff]  ;;  %v215_v57 = vld [vmem:[#allocation4 + $0xd8] sm:$0xff]  ;;  %v202_v59 = vld [vmem:[#allocation4 + $0x70] sm:$0xff] }
  0x58   :  { %1002 = vmatpush3.bf16.msra.mxu0 %v1001_v43  ;;  %v1007_v58 = vpack.c.bf16 %v253_v55, %v250_v54  ;;  %v205_v60 = vld [vmem:[#allocation4 + $0x88] sm:$0xff]  ;;  %v219_v61 = vld [vmem:[#allocation4 + $0xf8] sm:$0xff]  ;;  %v222_v62 = vld [vmem:[#allocation4 + $0x110] sm:$0xff]  ;;  %v953_v3 = vpack.c.bf16 %v215_v57, %v212_v52 }
  0x59   :  { %849 = vmatmul.mubr.msk.f32.gmra.mrb[2].mxu1 %vm100_vm0, %v79_v27  ;;  %1004 = vmatprep.subr.bf16.mxu0 %v1003_v48  ;;  %v256_v63 = vld [vmem:[#allocation4 + $0x220] sm:$0xff]  ;;  %v1009_v1 = vpack.c.bf16 %v205_v60, %v202_v59  ;;  %v259_v2 = vld [vmem:[#allocation4 + $0x238] sm:$0xff]  ;;  %v218_v4 = vld [vmem:[#allocation4 + $0xf0] sm:$0xff]  ;;  %v955_v8 = vpack.c.bf16 %v222_v62, %v219_v61 }
  0x5a   :  { %942 = vmatpush1.bf16.msra.mxu1 %v941_v28  ;;  %v1011_v5 = vpack.c.bf16 %v259_v2, %v256_v63  ;;  %v208_v6 = vld [vmem:[#allocation4 + $0xa0] sm:$0xff]  ;;  %v211_v7 = vld [vmem:[#allocation4 + $0xb8] sm:$0xff]  ;;  %v221_v9 = vld [vmem:[#allocation4 + $0x108] sm:$0xff] }
  0x5b   :  { %944 = vmatprep.subr.bf16.mxu1 %v943_v29  ;;  %v262_v10 = vld [vmem:[#allocation4 + $0x250] sm:$0xff]  ;;  %v265_v11 = vld [vmem:[#allocation4 + $0x268] sm:$0xff]  ;;  %v228_v13 = vld [vmem:[#allocation4 + $0x140] sm:$0xff]  ;;  %v1013_v14 = vpack.c.bf16 %v211_v7, %v208_v6  ;;  %v957_v15 = vpack.c.bf16 %v221_v9, %v218_v4 }
  0x5c   :  { %1006 = vmatpush3.bf16.msra.mxu0 %v1005_v53  ;;  %v225_v12 = vld [vmem:[#allocation4 + $0x128] sm:$0xff]  ;;  %v224_v16 = vld [vmem:[#allocation4 + $0x120] sm:$0xff]  ;;  %v1015_v17 = vpack.c.bf16 %v265_v11, %v262_v10  ;;  %v214_v18 = vld [vmem:[#allocation4 + $0xd0] sm:$0xff] }
  0x5d   :  { %1008 = vmatprep.subr.bf16.mxu0 %v1007_v58  ;;  %v217_v19 = vld [vmem:[#allocation4 + $0xe8] sm:$0xff]  ;;  %v959_v20 = vpack.c.bf16 %v228_v13, %v225_v12  ;;  %v227_v21 = vld [vmem:[#allocation4 + $0x138] sm:$0xff]  ;;  %v268_v22 = vld [vmem:[#allocation4 + $0x280] sm:$0xff] }
  0x5e   :  { %946 = vmatpush1.bf16.msra.mxu1 %v945_v36  ;;  %v271_v23 = vld [vmem:[#allocation4 + $0x298] sm:$0xff]  ;;  %v234_v25 = vld [vmem:[#allocation4 + $0x170] sm:$0xff]  ;;  %v1017_v26 = vpack.c.bf16 %v217_v19, %v214_v18  ;;  %v961_v27 = vpack.c.bf16 %v227_v21, %v224_v16  ;;  %v220_v30 = vld [vmem:[#allocation4 + $0x100] sm:$0xff] }
  0x5f   :  { %948 = vmatprep.subr.bf16.mxu1 %v947_v41  ;;  %v231_v24 = vld [vmem:[#allocation4 + $0x158] sm:$0xff]  ;;  %v230_v28 = vld [vmem:[#allocation4 + $0x150] sm:$0xff]  ;;  %v1019_v29 = vpack.c.bf16 %v271_v23, %v268_v22  ;;  %v233_v33 = vld [vmem:[#allocation4 + $0x168] sm:$0xff] }
  0x60   :  { %1010 = vmatpush3.bf16.msra.mxu0 %v1009_v1  ;;  %v223_v31 = vld [vmem:[#allocation4 + $0x118] sm:$0xff]  ;;  %v963_v32 = vpack.c.bf16 %v234_v25, %v231_v24  ;;  %v274_v34 = vld [vmem:[#allocation4 + $0x2b0] sm:$0xff]  ;;  %v277_v35 = vld [vmem:[#allocation4 + $0x2c8] sm:$0xff]  ;;  %v965_v39 = vpack.c.bf16 %v233_v33, %v230_v28 }
  0x61   :  { %1012 = vmatprep.subr.bf16.mxu0 %v1011_v5  ;;  %v237_v36 = vld [vmem:[#allocation4 + $0x188] sm:$0xff]  ;;  %v240_v37 = vld [vmem:[#allocation4 + $0x1a0] sm:$0xff]  ;;  %v1021_v38 = vpack.c.bf16 %v223_v31, %v220_v30  ;;  %v1023_v40 = vpack.c.bf16 %v277_v35, %v274_v34  ;;  %v239_v43 = vld [vmem:[#allocation4 + $0x198] sm:$0xff] }
  0x62   :  { %950 = vmatpush1.bf16.msra.mxu1 %v949_v51  ;;  %v967_v41 = vpack.c.bf16 %v240_v37, %v237_v36  ;;  %v236_v42 = vld [vmem:[#allocation4 + $0x180] sm:$0xff]  ;;  %v243_v44 = vld [vmem:[#allocation4 + $0x1b8] sm:$0xff]  ;;  %v246_v45 = vld [vmem:[#allocation4 + $0x1d0] sm:$0xff]  ;;  %v90_v36 = vlaneseq }
  0x63   :  { %952 = vmatprep.subr.bf16.mxu1 %v951_v56  ;;  %v969_v46 = vpack.c.bf16 %v239_v43, %v236_v42  ;;  %v971_v47 = vpack.c.bf16 %v246_v45, %v243_v44  ;;  %v242_v48 = vld [vmem:[#allocation4 + $0x1b0] sm:$0xff]  ;;  %v245_v49 = vld [vmem:[#allocation4 + $0x1c8] sm:$0xff]  ;;  %v252_v51 = vld [vmem:[#allocation4 + $0x200] sm:$0xff] }
  0x64   :  { %1014 = vmatpush3.bf16.msra.mxu0 %v1013_v14  ;;  %v249_v50 = vld [vmem:[#allocation4 + $0x1e8] sm:$0xff]  ;;  %v973_v52 = vpack.c.bf16 %v245_v49, %v242_v48  ;;  %v248_v54 = vld [vmem:[#allocation4 + $0x1e0] sm:$0xff]  ;;  %v251_v55 = vld [vmem:[#allocation4 + $0x1f8] sm:$0xff]  ;;  %v1383_v37 = vshrl.u32 %v90_v36, 7 }
  0x65   :  { %1016 = vmatprep.subr.bf16.mxu0 %v1015_v17  ;;  %v975_v53 = vpack.c.bf16 %v252_v51, %v249_v50  ;;  %v255_v56 = vld [vmem:[#allocation4 + $0x218] sm:$0xff]  ;;  %v258_v57 = vld [vmem:[#allocation4 + $0x230] sm:$0xff]  ;;  %v977_v58 = vpack.c.bf16 %v251_v55, %v248_v54  ;;  %v257_v61 = vld [vmem:[#allocation4 + $0x228] sm:$0xff] }
  0x66   :  { %954 = vmatpush1.bf16.msra.mxu1 %v953_v3  ;;  %v979_v59 = vpack.c.bf16 %v258_v57, %v255_v56  ;;  %v254_v60 = vld [vmem:[#allocation4 + $0x210] sm:$0xff]  ;;  %v261_v62 = vld [vmem:[#allocation4 + $0x248] sm:$0xff]  ;;  %v264_v63 = vld [vmem:[#allocation4 + $0x260] sm:$0xff] }
  0x67   :  { %956 = vmatprep.subr.bf16.mxu1 %v955_v8  ;;  %v981_v1 = vpack.c.bf16 %v257_v61, %v254_v60  ;;  %v983_v2 = vpack.c.bf16 %v264_v63, %v261_v62  ;;  %v260_v3 = vld [vmem:[#allocation4 + $0x240] sm:$0xff]  ;;  %v263_v4 = vld [vmem:[#allocation4 + $0x258] sm:$0xff]  ;;  %v270_v6 = vld [vmem:[#allocation4 + $0x290] sm:$0xff] }
  0x68   :  { %1018 = vmatpush3.bf16.msra.mxu0 %v1017_v26  ;;  %v267_v5 = vld [vmem:[#allocation4 + $0x278] sm:$0xff]  ;;  %v985_v7 = vpack.c.bf16 %v263_v4, %v260_v3  ;;  %v266_v9 = vld [vmem:[#allocation4 + $0x270] sm:$0xff]  ;;  %v269_v10 = vld [vmem:[#allocation4 + $0x288] sm:$0xff] }
  0x69   :  { %1020 = vmatprep.subr.bf16.mxu0 %v1019_v29  ;;  %v987_v8 = vpack.c.bf16 %v270_v6, %v267_v5  ;;  %v273_v11 = vld [vmem:[#allocation4 + $0x2a8] sm:$0xff]  ;;  %v276_v12 = vld [vmem:[#allocation4 + $0x2c0] sm:$0xff]  ;;  %v989_v13 = vpack.c.bf16 %v269_v10, %v266_v9  ;;  %v275_v16 = vld [vmem:[#allocation4 + $0x2b8] sm:$0xff] }
  0x6a   :  { %958 = vmatpush1.bf16.msra.mxu1 %v957_v15  ;;  %v991_v14 = vpack.c.bf16 %v276_v12, %v273_v11  ;;  %v272_v15 = vld [vmem:[#allocation4 + $0x2a0] sm:$0xff]  ;;  %v226_v17 = vld [vmem:[#allocation4 + $0x130] sm:$0xff]  ;;  %v229_v19 = vld [vmem:[#allocation4 + $0x148] sm:$0xff] }
  0x6b   :  { %960 = vmatprep.subr.bf16.mxu1 %v959_v20  ;;  %v993_v18 = vpack.c.bf16 %v275_v16, %v272_v15  ;;  %v1025_v20 = vpack.c.bf16 %v229_v19, %v226_v17  ;;  %v279_v21 = vld [vmem:[#allocation4 + $0x2d8] sm:$0xff]  ;;  %v282_v22 = vld [vmem:[#allocation4 + $0x2f0] sm:$0xff]  ;;  %v280_v23 = vld [vmem:[#allocation4 + $0x2e0] sm:$0xff] }
  0x6c   :  { %1022 = vmatpush3.bf16.msra.mxu0 %v1021_v38  ;;  %v995_v24 = vpack.c.bf16 %v282_v22, %v279_v21  ;;  %v283_v25 = vld [vmem:[#allocation4 + $0x2f8] sm:$0xff]  ;;  %v278_v26 = vld [vmem:[#allocation4 + $0x2d0] sm:$0xff]  ;;  %v232_v30 = vld [vmem:[#allocation4 + $0x160] sm:$0xff]  ;;  %v1386_v38 = vsub.s32 0, %v1383_v37 }
  0x6d   :  { %1024 = vmatprep.subr.bf16.mxu0 %v1023_v40  ;;  %v1027_v28 = vpack.c.bf16 %v283_v25, %v280_v23  ;;  %v235_v31 = vld [vmem:[#allocation4 + $0x178] sm:$0xff]  ;;  %v460_v33 = vld [vmem:[#allocation6 + $0x8] sm:$0xff]  ;;  %v1392_v40 = vsub.s32 1, %v1383_v37  ;;  %v467_v4 = vld [vmem:[#allocation6 + $0x40] sm:$0xff] }
  0x6e   :  { %962 = vmatpush1.bf16.msra.mxu1 %v961_v27  ;;  %v281_v27 = vld [vmem:[#allocation4 + $0x2e8] sm:$0xff]  ;;  %v462_v34 = vld [vmem:[#allocation6 + $0x18] sm:$0xff]  ;;  %v469_v5 = vld [vmem:[#allocation6 + $0x50] sm:$0xff] }
  0x6f   :  { %964 = vmatprep.subr.bf16.mxu1 %v963_v32  ;;  %v997_v29 = vpack.c.bf16 %v281_v27, %v278_v26  ;;  %v1029_v32 = vpack.c.bf16 %v235_v31, %v232_v30  ;;  %v1031_v35 = vpack.c.bf16 %v462_v34, %v460_v33  ;;  %v464_v49 = vld [vmem:[#allocation6 + $0x28] sm:$0xff]  ;;  %v466_v50 = vld [vmem:[#allocation6 + $0x38] sm:$0xff]  ;;  %v471_v10 = vld [vmem:[#allocation6 + $0x60] sm:$0xff] }
  0x70   :  { %1026 = vmatpush3.bf16.msra.mxu0 %v1025_v20  ;;  %v1035_v57 = vpack.c.bf16 %v466_v50, %v464_v49  ;;  %v468_v61 = vld [vmem:[#allocation6 + $0x48] sm:$0xff]  ;;  %v470_v62 = vld [vmem:[#allocation6 + $0x58] sm:$0xff]  ;;  %v473_v11 = vld [vmem:[#allocation6 + $0x70] sm:$0xff] }
  0x71   :  { %1028 = vmatprep.subr.bf16.mxu0 %v1027_v28  ;;  %v1039_v3 = vpack.c.bf16 %v470_v62, %v468_v61  ;;  %v472_v6 = vld [vmem:[#allocation6 + $0x68] sm:$0xff]  ;;  %v475_v16 = vld [vmem:[#allocation6 + $0x80] sm:$0xff]  ;;  %v477_v17 = vld [vmem:[#allocation6 + $0x90] sm:$0xff] }
  0x72   :  { %966 = vmatpush1.bf16.msra.mxu1 %v965_v39  ;;  %v88_v39 = vld [vmem:[%s1431_s5] sm:$0x3]  ;;  %v476_v12 = vld [vmem:[#allocation6 + $0x88] sm:$0xff]  ;;  %v482_v19 = vld [vmem:[#allocation6 + $0xb8] sm:$0xff]  ;;  %v1049_v20 = vpack.c.bf16 %v477_v17, %v475_v16 }
  0x73   :  { %968 = vmatprep.subr.bf16.mxu1 %v967_v41  ;;  %v93_v41 = vrot.slane %v88_v39, %v1386_v38  ;;  %v97_v42 = vrot.slane %v88_v39, %v1392_v40  ;;  %v479_v22 = vld [vmem:[#allocation6 + $0xa0] sm:$0xff]  ;;  %v481_v23 = vld [vmem:[#allocation6 + $0xb0] sm:$0xff]  ;;  %v486_v25 = vld [vmem:[#allocation6 + $0xd8] sm:$0xff] }
  0x74   :  { %1030 = vmatpush3.bf16.msra.mxu0 %v1029_v32  ;;  %v1053_v26 = vpack.c.bf16 %v481_v23, %v479_v22  ;;  %v483_v28 = vld [vmem:[#allocation6 + $0xc0] sm:$0xff]  ;;  %v488_v30 = vld [vmem:[#allocation6 + $0xe8] sm:$0xff]  ;;  %v490_v31 = vld [vmem:[#allocation6 + $0xf8] sm:$0xff] }
  0x75   :  { %1032 = vmatprep.subr.bf16.mxu0 %v1031_v35  ;;  %v1059_v33 = vpack.c.bf16 %v490_v31, %v488_v30  ;;  %v487_v34 = vld [vmem:[#allocation6 + $0xe0] sm:$0xff]  ;;  %v489_v35 = vld [vmem:[#allocation6 + $0xf0] sm:$0xff]  ;;  %v492_v36 = vld [vmem:[#allocation6 + $0x108] sm:$0xff] }
  0x76   :  { %970 = vmatpush1.bf16.msra.mxu1 %v969_v46  ;;  %v459_v46 = vld [vmem:[#allocation6] sm:$0xff]  ;;  %v494_v39 = vld [vmem:[#allocation6 + $0x118] sm:$0xff]  ;;  %v497_v50 = vld [vmem:[#allocation6 + $0x130] sm:$0xff] }
  0x77   :  { %972 = vmatprep.subr.bf16.mxu1 %v971_v47  ;;  %v461_v47 = vld [vmem:[#allocation6 + $0x10] sm:$0xff]  ;;  %v495_v49 = vld [vmem:[#allocation6 + $0x120] sm:$0xff] }
  0x78   :  { %v503_v61 = vld [vmem:[#allocation6 + $0x160] sm:$0xff]  ;;  %v505_v62 = vld [vmem:[#allocation6 + $0x170] sm:$0xff] }
  0x79   :  { %v515_v16 = vld [vmem:[#allocation6 + $0x1c0] sm:$0xff]  ;;  %v517_v17 = vld [vmem:[#allocation6 + $0x1d0] sm:$0xff] }
  0x7a   :  { %974 = vmatpush1.bf16.msra.mxu1 %v973_v52  ;;  %v519_v22 = vld [vmem:[#allocation6 + $0x1e0] sm:$0xff]  ;;  %v521_v23 = vld [vmem:[#allocation6 + $0x1f0] sm:$0xff] }
  0x7b   :  { %976 = vmatprep.subr.bf16.mxu1 %v975_v53  ;;  %v1033_v53 = vpack.c.bf16 %v461_v47, %v459_v46  ;;  %v498_v46 = vld [vmem:[#allocation6 + $0x138] sm:$0xff]  ;;  %v725_v30 = vld [vmem:[#allocation7] sm:$0xff] }
  0x7e   :  { %978 = vmatpush1.bf16.msra.mxu1 %v977_v58  ;;  %v463_v58 = vld [vmem:[#allocation6 + $0x20] sm:$0xff] }
  0x7f   :  { %980 = vmatprep.subr.bf16.mxu1 %v979_v59  ;;  %v465_v59 = vld [vmem:[#allocation6 + $0x30] sm:$0xff] }
  0x82   :  { %982 = vmatpush1.bf16.msra.mxu1 %v981_v1 }
  0x83   :  { %984 = vmatprep.subr.bf16.mxu1 %v983_v2  ;;  %v1037_v2 = vpack.c.bf16 %v465_v59, %v463_v58  ;;  %v506_v58 = vld [vmem:[#allocation6 + $0x178] sm:$0xff] }
  0x86   :  { %986 = vmatpush1.bf16.msra.mxu1 %v985_v7  ;;  %v474_v7 = vld [vmem:[#allocation6 + $0x78] sm:$0xff] }
  0x87   :  { %988 = vmatprep.subr.bf16.mxu1 %v987_v8  ;;  %v1041_v8 = vpack.c.bf16 %v469_v5, %v467_v4  ;;  %v1043_v9 = vpack.c.bf16 %v474_v7, %v472_v6  ;;  %v507_v4 = vld [vmem:[#allocation6 + $0x180] sm:$0xff]  ;;  %v509_v5 = vld [vmem:[#allocation6 + $0x190] sm:$0xff]  ;;  %v512_v6 = vld [vmem:[#allocation6 + $0x1a8] sm:$0xff] }
  0x88   :  { %v514_v7 = vld [vmem:[#allocation6 + $0x1b8] sm:$0xff] }
  0x8a   :  { %990 = vmatpush1.bf16.msra.mxu1 %v989_v13  ;;  %v478_v13 = vld [vmem:[#allocation6 + $0x98] sm:$0xff] }
  0x8b   :  { %992 = vmatprep.subr.bf16.mxu1 %v991_v14  ;;  %v1045_v14 = vpack.c.bf16 %v473_v11, %v471_v10  ;;  %v1047_v15 = vpack.c.bf16 %v478_v13, %v476_v12  ;;  %v511_v10 = vld [vmem:[#allocation6 + $0x1a0] sm:$0xff]  ;;  %v513_v11 = vld [vmem:[#allocation6 + $0x1b0] sm:$0xff]  ;;  %v516_v12 = vld [vmem:[#allocation6 + $0x1c8] sm:$0xff] }
  0x8c   :  { %v518_v13 = vld [vmem:[#allocation6 + $0x1d8] sm:$0xff] }
  0x8e   :  { %994 = vmatpush1.bf16.msra.mxu1 %v993_v18  ;;  %v480_v18 = vld [vmem:[#allocation6 + $0xa8] sm:$0xff] }
  0x8f   :  { %996 = vmatprep.subr.bf16.mxu1 %v995_v24  ;;  %v1051_v21 = vpack.c.bf16 %v482_v19, %v480_v18  ;;  %v484_v24 = vld [vmem:[#allocation6 + $0xc8] sm:$0xff]  ;;  %v1089_v18 = vpack.c.bf16 %v517_v17, %v515_v16  ;;  %v525_v16 = vld [vmem:[#allocation6 + $0x210] sm:$0xff] }
  0x90   :  { %v1055_v27 = vpack.c.bf16 %v486_v25, %v484_v24  ;;  %v520_v19 = vld [vmem:[#allocation6 + $0x1e8] sm:$0xff]  ;;  %v1093_v24 = vpack.c.bf16 %v521_v23, %v519_v22 }
  0x91   :  { %v524_v25 = vld [vmem:[#allocation6 + $0x208] sm:$0xff] }
  0x92   :  { %998 = vmatpush1.bf16.msra.mxu1 %v997_v29  ;;  %v485_v29 = vld [vmem:[#allocation6 + $0xd0] sm:$0xff] }
  0x93   :  { %v1057_v32 = vpack.c.bf16 %v485_v29, %v483_v28  ;;  %v741_v28 = vld [vmem:[#allocation7 + $0x80] sm:$0xff]  ;;  %v742_v29 = vld [vmem:[#allocation7 + $0x88] sm:$0xff] }
  0x94   :  { %v1127_v31 = vpack.c.bf16 %v742_v29, %v741_v28  ;;  %v529_v28 = vld [vmem:[#allocation6 + $0x230] sm:$0xff] }
  0x96   :  { %1128 = vmatprep.subr.bf16.mxu1 %v1127_v31 }
 0x128   :  { %v173_v43 = vpop.f32.mrb[0].mxu1 }
 0x129   :  { %v174_v44 = vadd.f32 %v173_v43, %v93_v41  ;;  %v175_v45 = vpop.f32.mrb[1].mxu1  ;;  %v491_v43 = vld [vmem:[#allocation6 + $0x100] sm:$0xff] }
 0x12a   :  { %v176_v48 = vadd.f32 %v175_v45, %v97_v42  ;;  %v496_v45 = vld [vmem:[#allocation6 + $0x128] sm:$0xff] }
 0x12b   :  { %v184_v54 = vmax.f32 %v174_v44, 0.0  ;;  %v493_v44 = vld [vmem:[#allocation6 + $0x110] sm:$0xff] }
 0x12c   :  { %v185_v51 = vmax.f32 %v176_v48, 0.0  ;;  %v179_v52 = vpop.f32.mrb[2].mxu1  ;;  %v1065_v47 = vpack.c.bf16 %v493_v44, %v491_v43  ;;  %v1067_v48 = vpack.c.bf16 %v498_v46, %v496_v45  ;;  %v746_v43 = vld [vmem:[#allocation7 + $0xa8] sm:$0xff]  ;;  %v729_v46 = vld [vmem:[#allocation7 + $0x20] sm:$0xff] }
 0x12d   :  { %v180_v55 = vadd.f32 %v179_v52, %v93_v41  ;;  %v181_v56 = vpop.f32.mrb[3].mxu1  ;;  %v1061_v41 = vpack.c.bf16 %v489_v35, %v487_v34  ;;  %v502_v52 = vld [vmem:[#allocation6 + $0x158] sm:$0xff] }
 0x12e   :  { %365 = vmatprep.mubr.f32.mxu1 %v185_v51  ;;  %442 = vmatprep.mubr.f32.mxu0 %v185_v51  ;;  %v182_v60 = vadd.f32 %v181_v56, %v97_v42  ;;  %v1063_v42 = vpack.c.bf16 %v494_v39, %v492_v36  ;;  %v500_v51 = vld [vmem:[#allocation6 + $0x148] sm:$0xff]  ;;  %v501_v56 = vld [vmem:[#allocation6 + $0x150] sm:$0xff]  ;;  %v744_v34 = vld [vmem:[#allocation7 + $0x98] sm:$0xff] }
 0x12f   :  { %366 = vmatmul.mubr.f32.vlgmr.msra.gmra.mrb[4].mxu1 %v184_v54  ;;  %443 = vmatmul.mubr.f32.vlgmr.msra.gmra.mrb[0].mxu0 %v184_v54  ;;  %v186_v63 = vmax.f32 %v180_v55, 0.0  ;;  %v1071_v54 = vpack.c.bf16 %v502_v52, %v500_v51  ;;  %v499_v55 = vld [vmem:[#allocation6 + $0x140] sm:$0xff]  ;;  %v727_v39 = vld [vmem:[#allocation7 + $0x10] sm:$0xff] }
 0x130   :  { %v187_v1 = vmax.f32 %v182_v60, 0.0  ;;  %1034 = vmatpush1.bf16.msra.mxu0 %v1033_v53  ;;  %v1069_v53 = vpack.c.bf16 %v497_v50, %v495_v49  ;;  %v1073_v59 = vpack.c.bf16 %v501_v56, %v499_v55  ;;  %v748_v49 = vld [vmem:[#allocation7 + $0xb8] sm:$0xff]  ;;  %v731_v52 = vld [vmem:[#allocation7 + $0x30] sm:$0xff]  ;;  %v750_v55 = vld [vmem:[#allocation7 + $0xc8] sm:$0xff] }
 0x131   :  { %1036 = vmatprep.subr.bf16.mxu0 %v1035_v57  ;;  %v504_v57 = vld [vmem:[#allocation6 + $0x168] sm:$0xff] }
 0x132   :  { %371 = vmatprep.mubr.f32.mxu1 %v187_v1  ;;  %447 = vmatprep.mubr.f32.mxu0 %v187_v1  ;;  %v1075_v60 = vpack.c.bf16 %v506_v58, %v504_v57  ;;  %v510_v1 = vld [vmem:[#allocation6 + $0x198] sm:$0xff]  ;;  %v733_v58 = vld [vmem:[#allocation7 + $0x40] sm:$0xff] }
 0x133   :  { %372 = vmatmul.mubr.f32.gmra.mrb[6].mxu1 %v186_v63  ;;  %448 = vmatmul.mubr.f32.gmra.mrb[2].mxu0 %v186_v63  ;;  %v508_v63 = vld [vmem:[#allocation6 + $0x188] sm:$0xff] }
 0x134   :  { %1038 = vmatpush1.bf16.msra.mxu0 %v1037_v2  ;;  %v1077_v2 = vpack.c.bf16 %v505_v62, %v503_v61  ;;  %v752_v61 = vld [vmem:[#allocation7 + $0xd8] sm:$0xff] }
 0x135   :  { %1040 = vmatprep.subr.bf16.mxu0 %v1039_v3  ;;  %v1079_v3 = vpack.c.bf16 %v510_v1, %v508_v63  ;;  %v735_v1 = vld [vmem:[#allocation7 + $0x50] sm:$0xff] }
 0x138   :  { %1042 = vmatpush1.bf16.msra.mxu0 %v1041_v8  ;;  %v1081_v8 = vpack.c.bf16 %v509_v5, %v507_v4  ;;  %v754_v4 = vld [vmem:[#allocation7 + $0xe8] sm:$0xff] }
 0x139   :  { %1044 = vmatprep.subr.bf16.mxu0 %v1043_v9  ;;  %v1083_v9 = vpack.c.bf16 %v514_v7, %v512_v6  ;;  %v1399_v7 = vld [vmem:[%s1431_s5 + $0x2] sm:$0x7] }
 0x13c   :  { %1046 = vmatpush1.bf16.msra.mxu0 %v1045_v14  ;;  %v1085_v14 = vpack.c.bf16 %v513_v11, %v511_v10 }
 0x13d   :  { %1048 = vmatprep.subr.bf16.mxu0 %v1047_v15  ;;  %v1087_v15 = vpack.c.bf16 %v518_v13, %v516_v12 }
 0x140   :  { %1050 = vmatpush1.bf16.msra.mxu0 %v1049_v20  ;;  %v522_v20 = vld [vmem:[#allocation6 + $0x1f8] sm:$0xff] }
 0x141   :  { %1052 = vmatprep.subr.bf16.mxu0 %v1051_v21  ;;  %v1091_v21 = vpack.c.bf16 %v522_v20, %v520_v19  ;;  %v528_v19 = vld [vmem:[#allocation6 + $0x228] sm:$0xff]  ;;  %v530_v20 = vld [vmem:[#allocation6 + $0x238] sm:$0xff] }
 0x144   :  { %1054 = vmatpush1.bf16.msra.mxu0 %v1053_v26  ;;  %v526_v26 = vld [vmem:[#allocation6 + $0x218] sm:$0xff] }
 0x145   :  { %1056 = vmatprep.subr.bf16.mxu0 %v1055_v27  ;;  %v1095_v27 = vpack.c.bf16 %v526_v26, %v524_v25  ;;  %v1099_v26 = vpack.c.bf16 %v530_v20, %v528_v19  ;;  %v737_v20 = vld [vmem:[#allocation7 + $0x60] sm:$0xff] }
 0x148   :  { %1058 = vmatpush1.bf16.msra.mxu0 %v1057_v32  ;;  %v726_v32 = vld [vmem:[#allocation7 + $0x8] sm:$0xff] }
 0x149   :  { %1060 = vmatprep.subr.bf16.mxu0 %v1059_v33  ;;  %v743_v33 = vld [vmem:[#allocation7 + $0x90] sm:$0xff]  ;;  %v1129_v35 = vpack.c.bf16 %v726_v32, %v725_v30  ;;  %v532_v32 = vld [vmem:[#allocation6 + $0x248] sm:$0xff] }
 0x14a   :  { %v1131_v36 = vpack.c.bf16 %v744_v34, %v743_v33  ;;  %v534_v33 = vld [vmem:[#allocation6 + $0x258] sm:$0xff] }
 0x14b   :  { %1130 = vmatpush3.bf16.msra.mxu1 %v1129_v35 }
 0x14c   :  { %1062 = vmatpush1.bf16.msra.mxu0 %v1061_v41  ;;  %v728_v41 = vld [vmem:[#allocation7 + $0x18] sm:$0xff]  ;;  %1132 = vmatprep.subr.bf16.mxu1 %v1131_v36 }
 0x14d   :  { %1064 = vmatprep.subr.bf16.mxu0 %v1063_v42  ;;  %v745_v42 = vld [vmem:[#allocation7 + $0xa0] sm:$0xff]  ;;  %v1133_v44 = vpack.c.bf16 %v728_v41, %v727_v39 }
 0x14e   :  { %v1135_v45 = vpack.c.bf16 %v746_v43, %v745_v42  ;;  %v1103_v42 = vpack.c.bf16 %v534_v33, %v532_v32  ;;  %v531_v43 = vld [vmem:[#allocation6 + $0x240] sm:$0xff] }
 0x14f   :  { %1134 = vmatpush3.bf16.msra.mxu1 %v1133_v44  ;;  %v533_v44 = vld [vmem:[#allocation6 + $0x250] sm:$0xff] }
 0x150   :  { %1066 = vmatpush1.bf16.msra.mxu0 %v1065_v47  ;;  %v730_v47 = vld [vmem:[#allocation7 + $0x28] sm:$0xff]  ;;  %1136 = vmatprep.subr.bf16.mxu1 %v1135_v45 }
 0x151   :  { %1068 = vmatprep.subr.bf16.mxu0 %v1067_v48  ;;  %v747_v48 = vld [vmem:[#allocation7 + $0xb0] sm:$0xff]  ;;  %v1137_v50 = vpack.c.bf16 %v730_v47, %v729_v46  ;;  %v536_v45 = vld [vmem:[#allocation6 + $0x268] sm:$0xff]  ;;  %v538_v46 = vld [vmem:[#allocation6 + $0x278] sm:$0xff]  ;;  %v1105_v47 = vpack.c.bf16 %v533_v44, %v531_v43 }
 0x152   :  { %v1139_v51 = vpack.c.bf16 %v748_v49, %v747_v48  ;;  %v1107_v48 = vpack.c.bf16 %v538_v46, %v536_v45  ;;  %v535_v49 = vld [vmem:[#allocation6 + $0x260] sm:$0xff] }
 0x153   :  { %1138 = vmatpush3.bf16.msra.mxu1 %v1137_v50  ;;  %v537_v50 = vld [vmem:[#allocation6 + $0x270] sm:$0xff] }
 0x154   :  { %1070 = vmatpush1.bf16.msra.mxu0 %v1069_v53  ;;  %v732_v53 = vld [vmem:[#allocation7 + $0x38] sm:$0xff]  ;;  %1140 = vmatprep.subr.bf16.mxu1 %v1139_v51  ;;  %v540_v51 = vld [vmem:[#allocation6 + $0x288] sm:$0xff] }
 0x155   :  { %1072 = vmatprep.subr.bf16.mxu0 %v1071_v54  ;;  %v749_v54 = vld [vmem:[#allocation7 + $0xc0] sm:$0xff]  ;;  %v1141_v56 = vpack.c.bf16 %v732_v53, %v731_v52  ;;  %v542_v52 = vld [vmem:[#allocation6 + $0x298] sm:$0xff]  ;;  %v1109_v53 = vpack.c.bf16 %v537_v50, %v535_v49 }
 0x156   :  { %v1143_v57 = vpack.c.bf16 %v750_v55, %v749_v54  ;;  %v1111_v54 = vpack.c.bf16 %v542_v52, %v540_v51  ;;  %v539_v55 = vld [vmem:[#allocation6 + $0x280] sm:$0xff] }
 0x157   :  { %1142 = vmatpush3.bf16.msra.mxu1 %v1141_v56  ;;  %v541_v56 = vld [vmem:[#allocation6 + $0x290] sm:$0xff] }
 0x158   :  { %1074 = vmatpush1.bf16.msra.mxu0 %v1073_v59  ;;  %v734_v59 = vld [vmem:[#allocation7 + $0x48] sm:$0xff]  ;;  %1144 = vmatprep.subr.bf16.mxu1 %v1143_v57 }
 0x159   :  { %1076 = vmatprep.subr.bf16.mxu0 %v1075_v60  ;;  %v751_v60 = vld [vmem:[#allocation7 + $0xd0] sm:$0xff]  ;;  %v1145_v62 = vpack.c.bf16 %v734_v59, %v733_v58  ;;  %v544_v57 = vld [vmem:[#allocation6 + $0x2a8] sm:$0xff]  ;;  %v546_v58 = vld [vmem:[#allocation6 + $0x2b8] sm:$0xff]  ;;  %v1113_v59 = vpack.c.bf16 %v541_v56, %v539_v55 }
 0x15a   :  { %v1147_v63 = vpack.c.bf16 %v752_v61, %v751_v60  ;;  %v1115_v60 = vpack.c.bf16 %v546_v58, %v544_v57  ;;  %v543_v61 = vld [vmem:[#allocation6 + $0x2a0] sm:$0xff] }
 0x15b   :  { %1146 = vmatpush3.bf16.msra.mxu1 %v1145_v62  ;;  %v545_v62 = vld [vmem:[#allocation6 + $0x2b0] sm:$0xff] }
 0x15c   :  { %1078 = vmatpush1.bf16.msra.mxu0 %v1077_v2  ;;  %v736_v2 = vld [vmem:[#allocation7 + $0x58] sm:$0xff]  ;;  %1148 = vmatprep.subr.bf16.mxu1 %v1147_v63  ;;  %v548_v63 = vld [vmem:[#allocation6 + $0x2c8] sm:$0xff] }
 0x15d   :  { %1080 = vmatprep.subr.bf16.mxu0 %v1079_v3  ;;  %v753_v3 = vld [vmem:[#allocation7 + $0xe0] sm:$0xff]  ;;  %v1149_v5 = vpack.c.bf16 %v736_v2, %v735_v1  ;;  %v550_v1 = vld [vmem:[#allocation6 + $0x2d8] sm:$0xff]  ;;  %v1117_v2 = vpack.c.bf16 %v545_v62, %v543_v61 }
 0x15e   :  { %v1151_v6 = vpack.c.bf16 %v754_v4, %v753_v3  ;;  %v296_v3 = vsub.s32 2, %v1383_v37  ;;  %v1119_v4 = vpack.c.bf16 %v550_v1, %v548_v63 }
 0x15f   :  { %1150 = vmatpush3.bf16.msra.mxu1 %v1149_v5  ;;  %v547_v5 = vld [vmem:[#allocation6 + $0x2c0] sm:$0xff] }
 0x160   :  { %1082 = vmatpush1.bf16.msra.mxu0 %v1081_v8  ;;  %1152 = vmatprep.subr.bf16.mxu1 %v1151_v6  ;;  %v289_v8 = vrot.slane %v1399_v7, %v1386_v38  ;;  %v549_v6 = vld [vmem:[#allocation6 + $0x2d0] sm:$0xff] }
 0x161   :  { %1084 = vmatprep.subr.bf16.mxu0 %v1083_v9  ;;  %v293_v9 = vrot.slane %v1399_v7, %v1392_v40 }
 0x164   :  { %1086 = vmatpush1.bf16.msra.mxu0 %v1085_v14 }
 0x165   :  { %1088 = vmatprep.subr.bf16.mxu0 %v1087_v15  ;;  %v523_v15 = vld [vmem:[#allocation6 + $0x200] sm:$0xff] }
 0x166   :  { %v1097_v22 = vpack.c.bf16 %v525_v16, %v523_v15 }
 0x168   :  { %1090 = vmatpush1.bf16.msra.mxu0 %v1089_v18 }
 0x169   :  { %1092 = vmatprep.subr.bf16.mxu0 %v1091_v21 }
 0x16c   :  { %1094 = vmatpush1.bf16.msra.mxu0 %v1093_v24 }
 0x16d   :  { %1096 = vmatprep.subr.bf16.mxu0 %v1095_v27  ;;  %v527_v27 = vld [vmem:[#allocation6 + $0x220] sm:$0xff] }
 0x16e   :  { %v1101_v39 = vpack.c.bf16 %v529_v28, %v527_v27 }
 0x202   :  { %v367_v10 = vpop.f32.mrb[4].mxu1  ;;  %v883_v11 = vpop.f32.mrb[0].mxu0 }
 0x203   :  { %v368_v12 = vadd.f32 %v367_v10, %v289_v8  ;;  %v369_v13 = vpop.f32.mrb[5].mxu1  ;;  %v884_v14 = vpop.f32.mrb[1].mxu0  ;;  %v1121_v10 = vpack.c.bf16 %v549_v6, %v547_v5 }
 0x204   :  { %v370_v17 = vadd.f32 %v369_v13, %v293_v9  ;;  %v1405_v18 = vadd.f32 %v884_v14, %v883_v11  ;;  %v297_v11 = vrot.slane %v1399_v7, %v296_v3  ;;  %v551_v13 = vld [vmem:[#allocation6 + $0x2e0] sm:$0xff]  ;;  %v553_v14 = vld [vmem:[#allocation6 + $0x2f0] sm:$0xff] }
 0x205   :  { %v453_v25 = vmax.f32 %v368_v12, 0.0  ;;  %v1125_v15 = vpack.c.bf16 %v553_v14, %v551_v13 }
 0x206   :  { %v454_v21 = vmax.f32 %v370_v17, 0.0  ;;  %v373_v23 = vpop.f32.mrb[6].mxu1  ;;  %v886_v24 = vpop.f32.mrb[2].mxu0  ;;  %v445_v16 = vadd.f32 %v1405_v18, %v297_v11  ;;  %v555_v18 = vld [vmem:[%s1431_s5 + $0x5] sm:$0x3] }
 0x207   :  { %v374_v29 = vadd.f32 %v373_v23, %v289_v8  ;;  %v375_v30 = vpop.f32.mrb[7].mxu1  ;;  %v887_v31 = vpop.f32.mrb[3].mxu0  ;;  %v552_v8 = vld [vmem:[#allocation6 + $0x2e8] sm:$0xff]  ;;  %v756_v23 = vld [vmem:[#allocation7 + $0xf8] sm:$0xff]  ;;  %v564_v28 = vrot.slane %v555_v18, %v1392_v40 }
 0x208   :  { %631 = vmatprep.mubr.f32.mxu0 %v454_v21  ;;  %v376_v34 = vadd.f32 %v375_v30, %v293_v9  ;;  %v888_v35 = vadd.f32 %v887_v31, %v886_v24  ;;  %v554_v9 = vld [vmem:[#allocation6 + $0x2f8] sm:$0xff]  ;;  %v455_v37 = vmax.f32 %v445_v16, 0.0  ;;  %v738_v21 = vld [vmem:[#allocation7 + $0x68] sm:$0xff] }
 0x209   :  { %632 = vmatmul.mubr.f32.vlgmr.msra.gmra.mrb[4].mxu0 %v453_v25  ;;  %v456_v36 = vmax.f32 %v374_v29, 0.0  ;;  %v1123_v12 = vpack.c.bf16 %v554_v9, %v552_v8  ;;  %v1153_v7 = vpack.c.bf16 %v738_v21, %v737_v20  ;;  %v739_v25 = vld [vmem:[#allocation7 + $0x70] sm:$0xff] }
 0x20a   :  { %1098 = vmatpush1.bf16.msra.mxu0 %v1097_v22  ;;  %v457_v41 = vmax.f32 %v376_v34, 0.0  ;;  %v450_v17 = vadd.f32 %v888_v35, %v297_v11  ;;  %v755_v22 = vld [vmem:[#allocation7 + $0xf0] sm:$0xff] }
 0x20b   :  { %1100 = vmatprep.subr.bf16.mxu0 %v1099_v26  ;;  %1154 = vmatpush3.bf16.msra.mxu1 %v1153_v7  ;;  %v1155_v24 = vpack.c.bf16 %v756_v23, %v755_v22  ;;  %v740_v26 = vld [vmem:[#allocation7 + $0x78] sm:$0xff] }
 0x20c   :  { %637 = vmatprep.mubr.f32.mxu0 %v457_v41  ;;  %v458_v19 = vmax.f32 %v450_v17, 0.0  ;;  %v1157_v27 = vpack.c.bf16 %v740_v26, %v739_v25 }
 0x20d   :  { %638 = vmatmul.mubr.f32.gmra.mrb[6].mxu0 %v456_v36  ;;  %1156 = vmatprep.subr.bf16.mxu1 %v1155_v24 }
 0x20e   :  { %1102 = vmatpush1.bf16.msra.mxu0 %v1101_v39  ;;  %708 = vmatprep.mubr.f32.mxu0 %v1282_v0 }
 0x20f   :  { %1104 = vmatprep.subr.bf16.mxu0 %v1103_v42  ;;  %1158 = vmatpush3.bf16.msra.mxu1 %v1157_v27 }
 0x212   :  { %1106 = vmatpush1.bf16.msra.mxu0 %v1105_v47 }
 0x213   :  { %1108 = vmatprep.subr.bf16.mxu0 %v1107_v48 }
 0x216   :  { %1110 = vmatpush1.bf16.msra.mxu0 %v1109_v53 }
 0x217   :  { %1112 = vmatprep.subr.bf16.mxu0 %v1111_v54 }
 0x21a   :  { %1114 = vmatpush1.bf16.msra.mxu0 %v1113_v59 }
 0x21b   :  { %1116 = vmatprep.subr.bf16.mxu0 %v1115_v60 }
 0x21e   :  { %1118 = vmatpush1.bf16.msra.mxu0 %v1117_v2 }
 0x21f   :  { %1120 = vmatprep.subr.bf16.mxu0 %v1119_v4 }
 0x222   :  { %1122 = vmatpush1.bf16.msra.mxu0 %v1121_v10 }
 0x223   :  { %1124 = vmatprep.subr.bf16.mxu0 %v1123_v12 }
 0x226   :  { %1126 = vmatpush1.bf16.msra.mxu0 %v1125_v15 }
 0x229   :  { %709 = vmatmul.mubr.f32.vlgmr.msra.gmra.mrb[4].mxu0 %v455_v37 }
 0x22a   :  { %714 = vmatprep.mubr.f32.mxu0 %v1282_v0  ;;  %v560_v0 = vrot.slane %v555_v18, %v1386_v38  ;;  %v850_v38 = vld [vmem:[%s1431_s5 + $0x7] ss:$0 sm:$0xff] }
 0x22d   :  { %715 = vmatmul.mubr.f32.gmra.mrb[6].mxu0 %v458_v19 }
 0x2fc   :  { %v710_v29 = vpop.f32.mrb[4].mxu0 }
 0x2fd   :  { %v1159_v30 = vadd.f32 %v710_v29, %v560_v0  ;;  %v712_v31 = vpop.f32.mrb[5].mxu0 }
 0x2fe   :  { %v1160_v32 = vadd.f32 %v712_v31, %v564_v28 }
 0x2ff   :  { %v721_v35 = vmax.f32 %v1159_v30, 0.0 }
 0x300   :  { %v722_v33 = vmax.f32 %v1160_v32, 0.0  ;;  %v716_v34 = vpop.f32.mrb[6].mxu0 }
 0x301   :  { %v1161_v36 = vadd.f32 %v716_v34, %v560_v0  ;;  %v718_v39 = vpop.f32.mrb[7].mxu0 }
 0x302   :  { %v1162_v41 = vadd.f32 %v718_v39, %v564_v28  ;;  %828 = vmatprep.mubr.f32.mxu1 %v722_v33 }
 0x303   :  { %829 = vmatmul.mubr.f32.vlgmr.msra.gmra.mrb[8].mxu1 %v721_v35  ;;  %v723_v43 = vmax.f32 %v1161_v36, 0.0 }
 0x304   :  { %v724_v42 = vmax.f32 %v1162_v41, 0.0 }
 0x306   :  { %833 = vmatprep.mubr.f32.mxu1 %v724_v42 }
 0x307   :  { %834 = vmatmul.mubr.f32.gmra.mrb[10].mxu1 %v723_v43 }
 0x3d6   :  { %v921_v44 = vpop.f32.mrb[8].mxu1 }
 0x3d7   :  { %v922_v40 = vpop.f32.mrb[9].mxu1 }
 0x3d8   :  { %v923_v45 = vadd.f32 %v922_v40, %v921_v44 }
 0x3da   :  { %v831_v46 = vadd.f32 %v923_v45, %v850_v38  ;;  %v924_v47 = vpop.f32.mrb[10].mxu1 }
 0x3db   :  { %v925_v48 = vpop.f32.mrb[11].mxu1 }
 0x3dc   :  { %839 = vst [vmem:[%s1432_s6] sm:$0xff] %v831_v46  ;;  %v926_v49 = vadd.f32 %v925_v48, %v924_v47 }
 0x3de   :  { %v836_v50 = vadd.f32 %v926_v49, %v850_v38 }
 0x3e0   :  { %840 = vst [vmem:[%s1432_s6 + $0x8] sm:$0xff] %v836_v50 }
 0x3e1   :  { %845 = vsyncpa [#allocation3], 1 }
 0x3e2   :  { %846 = vsyncpa [#allocation5], 1 }
 0x3e3   :  { %847 = vsyncpa [#allocation8], 1 }

</bundles_post_ra>
